<compile_context>
chip_gen: v6e
topology: v6e:2x2x1
jax: 0.10.0
libtpu: 0.0.40
codegen_flags: <defaults>
</compile_context>

<pallas_src>
import jax
import jax.numpy as jnp
from jax.experimental import pallas as pl
from jax.experimental.pallas import tpu as pltpu


def linear_kernel(x_ref, w_ref, b_ref, o_ref):
    # Hot path: MXU matmul + broadcast bias add, all in VMEM.
    o_ref[...] = (
        jnp.dot(x_ref[...], w_ref[...], preferred_element_type=jnp.float32)
        + b_ref[...]
    ).astype(o_ref.dtype)


def _round_up(a: int, m: int) -> int:
    return ((a + m - 1) // m) * m


def logistic_regression_net(x, weight, bias, *, tb_cap: int = 4096):
    """Forward pass of LogisticRegressionNet.

    x:      (B, C) float32
    weight: (N, C) float32  (PyTorch nn.Linear layout; N == 2 here)
    bias:   (N,)   float32
    returns (B, N) float32
    """
    B, C = x.shape
    N = weight.shape[0]

    w_t = weight.T.astype(jnp.float32)       # (C, N) — glue transpose in plain JAX
    b2d = bias.reshape(1, N).astype(jnp.float32)
    x = x.astype(jnp.float32)

    # --- Batch tile selection -------------------------------------------------
    # Keep each x tile buffer under ~8 MiB so the double-buffered pipeline fits
    # comfortably in scoped VMEM on every TPU generation (v5e/v6e/v7x).
    bytes_per_row = 4 * C
    per_buffer_budget = 8 * 1024 * 1024
    tb_from_budget = max(8, (per_buffer_budget // bytes_per_row) // 8 * 8)
    TB = min(_round_up(B, 8), tb_from_budget, tb_cap)

    # Pad batch to a multiple of TB so every grid step sees a full tile.
    Bp = _round_up(B, TB)
    if Bp != B:
        x = jnp.pad(x, ((0, Bp - B), (0, 0)))

    grid = (Bp // TB,)

    out = pl.pallas_call(
        linear_kernel,
        out_shape=jax.ShapeDtypeStruct((Bp, N), jnp.float32),
        grid_spec=pl.GridSpec(
            grid=grid,
            in_specs=[
                pl.BlockSpec((TB, C), lambda i: (i, 0)),   # streamed over batch
                pl.BlockSpec((C, N), lambda i: (0, 0)),    # weight: resident
                pl.BlockSpec((1, N), lambda i: (0, 0)),    # bias:   resident
            ],
            out_specs=pl.BlockSpec((TB, N), lambda i: (i, 0)),
        ),
        compiler_params=pltpu.CompilerParams(
            # Each batch tile is independent -> megacore sharding on v7x.
            dimension_semantics=("parallel",),
        ),
        cost_estimate=pl.CostEstimate(
            flops=2 * Bp * C * N,
            bytes_accessed=4 * (Bp * C + C * N + N + Bp * N),
            transcendentals=0,
        ),
    )(x, w_t, b2d)

    return out[:B] if Bp != B else out


if __name__ == "__main__":
    key = jax.random.PRNGKey(0)
    k_x, k_w, k_b = jax.random.split(key, 3)

    batch = 8
    input_channels = 32

    # Deterministic synthetic parameters (PyTorch-Linear shapes: W (2,C), b (2,))
    bound = 1.0 / (input_channels ** 0.5)
    x = jax.random.normal(k_x, (batch, input_channels), dtype=jnp.float32)
    weight = jax.random.uniform(
        k_w, (2, input_channels), minval=-bound, maxval=bound, dtype=jnp.float32
    )
    bias = jax.random.uniform(
        k_b, (2,), minval=-bound, maxval=bound, dtype=jnp.float32
    )

    out = logistic_regression_net(x, weight, bias)
    out = jax.block_until_ready(out)

    # Correctness check against plain-JAX reference.
    ref = x @ weight.T + bias
    assert out.shape == (batch, 2)
    assert jnp.allclose(out, ref, atol=1e-5, rtol=1e-5)

    print("KERNEL_OK")
</pallas_src>

<mosaic_0001>
module attributes {stable_mosaic.version = 11 : i64} {
  func.func @linear_kernel(%arg0: i32, %arg1: memref<8x32xf32, #tpu.memory_space<vmem>>, %arg2: memref<32x2xf32, #tpu.memory_space<vmem>>, %arg3: memref<1x2xf32, #tpu.memory_space<vmem>>, %arg4: memref<8x2xf32, #tpu.memory_space<vmem>>) attributes {dimension_semantics = [#tpu.dimension_semantics<parallel>], iteration_bounds = array<i64: 1>, scalar_prefetch = 0 : i64, scratch_operands = 0 : i64, tpu.core_type = #tpu.core_type<tc>, window_params = [{transform_indices = @transform_0, window_bounds = array<i64: 8, 32>}, {pipeline_mode = #tpu.pipeline_mode<synchronous>, transform_indices = @transform_1, window_bounds = array<i64: 32, 2>}, {pipeline_mode = #tpu.pipeline_mode<synchronous>, transform_indices = @transform_2, window_bounds = array<i64: 1, 2>}, {transform_indices = @transform_3, window_bounds = array<i64: 8, 2>}]} {
    %c0 = arith.constant 0 : index
    %c0_0 = arith.constant 0 : index
    %0 = vector.load %arg1[%c0, %c0_0] : memref<8x32xf32, #tpu.memory_space<vmem>>, vector<8x32xf32>
    %c0_1 = arith.constant 0 : index
    %c0_2 = arith.constant 0 : index
    %1 = vector.load %arg2[%c0_1, %c0_2] : memref<32x2xf32, #tpu.memory_space<vmem>>, vector<32x2xf32>
    %cst = arith.constant dense<0.000000e+00> : vector<8x2xf32>
    %2 = tpu.matmul %0, %1, %cst {dimension_numbers = #tpu.dot_dimension_numbers<[1], [0], [0], [1], [0, 0, 1, 1], [], []>} : vector<8x32xf32>, vector<32x2xf32>, vector<8x2xf32> -> vector<8x2xf32>
    %c0_3 = arith.constant 0 : index
    %c0_4 = arith.constant 0 : index
    %3 = vector.load %arg3[%c0_3, %c0_4] : memref<1x2xf32, #tpu.memory_space<vmem>>, vector<1x2xf32>
    %4 = vector.broadcast %3 : vector<1x2xf32> to vector<8x2xf32>
    %5 = arith.addf %2, %4 : vector<8x2xf32>
    %c0_5 = arith.constant 0 : index
    %c0_6 = arith.constant 0 : index
    %6 = vector.load %arg4[%c0_5, %c0_6] : memref<8x2xf32, #tpu.memory_space<vmem>>, vector<8x2xf32>
    tpu.vector_store %arg4[%c0_5, %c0_6], %5 {strides = array<i32>} : memref<8x2xf32, #tpu.memory_space<vmem>>, vector<8x2xf32>,
    return
  }
  func.func @transform_0(%arg0: i32) -> (i32, i32) {
    %c0_i32 = arith.constant 0 : i32
    %c0_i32_0 = arith.constant 0 : i32
    return %arg0, %c0_i32 : i32, i32
  }
  func.func @transform_1(%arg0: i32) -> (i32, i32) {
    %c0_i32 = arith.constant 0 : i32
    %c0_i32_0 = arith.constant 0 : i32
    %c0_i32_1 = arith.constant 0 : i32
    return %c0_i32, %c0_i32_0 : i32, i32
  }
  func.func @transform_2(%arg0: i32) -> (i32, i32) {
    %c0_i32 = arith.constant 0 : i32
    %c0_i32_0 = arith.constant 0 : i32
    %c0_i32_1 = arith.constant 0 : i32
    return %c0_i32, %c0_i32_0 : i32, i32
  }
  func.func @transform_3(%arg0: i32) -> (i32, i32) {
    %c0_i32 = arith.constant 0 : i32
    %c0_i32_0 = arith.constant 0 : i32
    return %arg0, %c0_i32 : i32, i32
  }
}

</mosaic_0001>

<bundles_post_ra>
// kernel: tpu_custom_call.1
= control target key start
LH: loop header
LB: loop body
LE: loop exit
PB: predicated region body
PF: predicated region fallthrough
CT: control target
= control target key end

     0   :  { %v126_v0 = vmov 0.0   ;;  %vm127_vm0 = vmmov 0   ;;  %vm26_vm1 = vcmask 261120   ;;  %vm100_vm2 = vcmask 15360   ;;  %s169_s1 = inlined_call_operand.vmem [shape: f32[32,2], index: 1, kind: input, shape index: {}]   ;;  %s170_s0 = inlined_call_operand.vmem [shape: f32[8,32], index: 0, kind: input, shape index: {}]   ;;  %s171_s2 = inlined_call_operand.vmem [shape: f32[1,2], index: 2, kind: input, shape index: {}]   ;;  %s172_s3 = inlined_call_operand.vmem [shape: f32[8,2], index: 3, kind: output, shape index: {}]  }
   0x1   :  { %113 = vmatprep.subr.mxu0 %v126_v0  ;;  %v18_v1 = vld [vmem:[%s169_s1 + $0x18] sm:$0xff]  ;;  %v17_v2 = vld [vmem:[%s169_s1 + $0x10] sm:$0xff]  ;;  %121 = vmatprep.mubr.msk.f32.mxu0 %vm127_vm0, %v126_v0  ;;  %v16_v3 = vld [vmem:[%s169_s1 + $0x8] sm:$0xff] }
   0x2   :  { %114 = vmatpush3.msra.mxu0 %v18_v1  ;;  %v15_v4 = vld [vmem:[%s169_s1] sm:$0xff] }
   0x3   :  { %115 = vmatprep.subr.mxu0 %v126_v0  ;;  %v14_v5 = vld [vmem:[%s170_s0] sm:$0xff] }
   0x4   :  { %116 = vmatpush3.msra.mxu0 %v17_v2  ;;  %v106_v6 = vld [vmem:[%s171_s2] ss:$0 sm:$0xff] }
   0x5   :  { %117 = vmatprep.subr.mxu0 %v126_v0 }
   0x6   :  { %118 = vmatpush3.msra.mxu0 %v16_v3 }
   0x7   :  { %119 = vmatprep.subr.mxu0 %v126_v0 }
   0x8   :  { %120 = vmatpush3.msra.mxu0 %v15_v4 }
   0x9   :  { %122 = vmatmul.mubr.msk.f32.vlgmr.msra.gmra.mxu0 %vm26_vm1, %v14_v5 }
  0xc9   :  { %v96_v7 = vpop.f32.mrf.mxu0 }
  0xca   :  { %v97_v8 = vadd.f32 %v106_v6, %v96_v7 }
  0xcb   :  { %v123_v9 = vpop.f32.mrf.mxu0 }
  0xcc   :  { %101 = vst.msk [vmem:[%s172_s3] sm:$0xff] %vm100_vm2, %v97_v8 }

</bundles_post_ra>
